<compile_context>
chip_gen: v7x
topology: tpu7x:2x2x1
jax: 0.10.0
libtpu: 0.0.40
codegen_flags: <defaults>
</compile_context>

<pallas_src>
from functools import partial

import numpy as np
import jax
import jax.numpy as jnp
from jax.experimental import pallas as pl
from jax.experimental.pallas import tpu as pltpu

NUM_PIN_LINEAR_BASIS_ELEMENTS = 9
MV = 16  # multivector components


def _round_up(x: int, m: int) -> int:
    return (x + m - 1) // m * m


# ----------------------------------------------------------------------------
# Basis maps for Pin(3,0,1)-equivariant linear maps (gatr.primitives.linear):
# 5 grade projections + 4 "multiply by e0" maps.  Component ordering:
# [1, e0, e1, e2, e3, e01, e02, e03, e12, e13, e23, e012, e013, e023, e123, e0123]
# ----------------------------------------------------------------------------
def make_basis() -> jnp.ndarray:
    basis = np.zeros((NUM_PIN_LINEAR_BASIS_ELEMENTS, MV, MV), dtype=np.float32)
    grades = [[0], [1, 2, 3, 4], [5, 6, 7, 8, 9, 10], [11, 12, 13, 14], [15]]
    for b, idxs in enumerate(grades):
        for x in idxs:
            basis[b, x, x] = 1.0
    e0_maps = [
        [(0, 1)],                       # scalar -> e0
        [(2, 5), (3, 6), (4, 7)],       # e_i -> e0i
        [(8, 11), (9, 12), (10, 13)],   # e_ij -> e0ij
        [(14, 15)],                     # e123 -> e0123
    ]
    for k, pairs in enumerate(e0_maps):
        for x, y in pairs:
            basis[5 + k, x, y] = 1.0
    return jnp.asarray(basis)


# ----------------------------------------------------------------------------
# Deterministic parameter init, following EquiLinear.reset_parameters("default")
# (same bounds / shapes; jax.random instead of torch RNG).
# ----------------------------------------------------------------------------
def init_params(key, in_mv, out_mv, in_s, out_s):
    gain = 1.0
    additional_factor = 1.0 / np.sqrt(3.0)
    mv_factor = gain * additional_factor * np.sqrt(3.0)   # = 1.0 ("default")
    s_factor = gain * additional_factor * np.sqrt(3.0)    # = 1.0
    mvs_bias_shift = 0.0
    comp_factors = np.sqrt(np.array([1.0, 4.0, 6.0, 2.0, 0.5, 0.5, 1.5, 1.5, 0.5]))

    keys = jax.random.split(key, 8)

    # weight: (out_mv, in_mv, 9), per-basis-element uniform bounds
    fan_in = max(in_mv, 1)
    bound_b = comp_factors * (mv_factor / np.sqrt(fan_in))
    weight = jax.random.uniform(
        keys[0], (out_mv, in_mv, NUM_PIN_LINEAR_BASIS_ELEMENTS),
        minval=-1.0, maxval=1.0) * bound_b[None, None, :]
    # with scalar inputs present, basis element 0 is re-initialized with /sqrt(2)
    bound0 = comp_factors[0] * mv_factor / np.sqrt(fan_in) / np.sqrt(2.0)
    w0 = jax.random.uniform(keys[1], (out_mv, in_mv), minval=-bound0, maxval=bound0)
    weight = weight.at[..., 0].set(w0)

    # s2mvs: Linear(in_s, out_mv, bias=True)  (torch layout: (out, in))
    bound = comp_factors[0] * mv_factor / np.sqrt(max(in_s, 1)) / np.sqrt(2.0)
    s2mvs_w = jax.random.uniform(keys[2], (out_mv, in_s), minval=-bound, maxval=bound)
    fan = in_s + in_mv
    bound = comp_factors[0] / np.sqrt(fan)
    s2mvs_b = jax.random.uniform(
        keys[3], (out_mv,), minval=mvs_bias_shift - bound, maxval=mvs_bias_shift + bound)

    # s2s: Linear(in_s, out_s, bias=False); mvs2s: Linear(in_mv, out_s, bias=True)
    bound = s_factor / np.sqrt(max(in_s, 1)) / np.sqrt(2.0)
    s2s_w = jax.random.uniform(keys[4], (out_s, in_s), minval=-bound, maxval=bound)
    bound = s_factor / np.sqrt(max(in_mv, 1)) / np.sqrt(2.0)
    mvs2s_w = jax.random.uniform(keys[5], (out_s, in_mv), minval=-bound, maxval=bound)
    bound = s_factor / np.sqrt(in_mv + in_s)
    mvs2s_b = jax.random.uniform(keys[6], (out_s,), minval=-bound, maxval=bound)

    return dict(weight=weight, s2mvs_w=s2mvs_w, s2mvs_b=s2mvs_b,
                s2s_w=s2s_w, mvs2s_w=mvs2s_w, mvs2s_b=mvs2s_b)


# ----------------------------------------------------------------------------
# Token-independent weight precontraction (run ONCE, outside the hot path).
# Produces four small weight blocks + two biases:
#   w_mm: (in_mv*16, out_mv*16)   mv      -> mv       (sum_b weight ⊗ basis)
#   w_sm: (in_s,     out_mv*16)   scalars -> mv component 0
#   w_ms: (in_mv*16, out_s)       mv component 0 -> scalars
#   w_ss: (in_s,     out_s)       scalars -> scalars
#   b_mv: (1, out_mv*16)  (s2mvs bias on component 0), b_s: (1, out_s)
# No lane padding is needed: these are kept resident in VMEM as full blocks.
# ----------------------------------------------------------------------------
def precompute_fused_weights(params, basis, weight_dtype=jnp.bfloat16):
    weight = params["weight"]                      # (out_mv, in_mv, 9)
    out_mv, in_mv, _ = weight.shape
    in_s = params["s2mvs_w"].shape[1]
    out_s = params["mvs2s_w"].shape[0]

    # mv -> mv:  w_mm[(i,x), (j,y)] = sum_b weight[j,i,b] * basis[b,x,y]
    w_mm = jnp.einsum("jib,bxy->ixjy", weight, basis).reshape(in_mv * MV, out_mv * MV)

    # scalars -> multivector scalar component (component 0 of each out channel)
    w_sm = jnp.zeros((in_s, out_mv, MV), jnp.float32)
    w_sm = w_sm.at[:, :, 0].set(params["s2mvs_w"].T).reshape(in_s, out_mv * MV)

    # mv scalar component -> output scalars
    w_ms = jnp.zeros((in_mv, MV, out_s), jnp.float32)
    w_ms = w_ms.at[:, 0, :].set(params["mvs2s_w"].T).reshape(in_mv * MV, out_s)

    # scalars -> scalars
    w_ss = params["s2s_w"].T

    # biases (kept in f32 for the f32 accumulate + bias-add inside the kernel)
    b_mv = jnp.zeros((out_mv, MV), jnp.float32)
    b_mv = b_mv.at[:, 0].set(params["s2mvs_b"]).reshape(1, out_mv * MV)
    b_s = params["mvs2s_b"].reshape(1, out_s).astype(jnp.float32)

    return dict(w_mm=w_mm.astype(weight_dtype), w_sm=w_sm.astype(weight_dtype),
                w_ms=w_ms.astype(weight_dtype), w_ss=w_ss.astype(weight_dtype),
                b_mv=b_mv, b_s=b_s)


# ----------------------------------------------------------------------------
# Pallas kernel: one token tile.  Streamed inputs are cast to bf16 in VMEM and
# hit the MXU against the resident (constant index_map) bf16 weights with f32
# accumulation; bias add in f32; stores in the output dtype.
# ----------------------------------------------------------------------------
def _equi_linear_kernel(mv_ref, s_ref, w_mm_ref, w_sm_ref, w_ms_ref, w_ss_ref,
                        b_mv_ref, b_s_ref, out_mv_ref, out_s_ref):
    x_mv = mv_ref[...].astype(jnp.bfloat16)
    x_s = s_ref[...].astype(jnp.bfloat16)

    acc_mv = jnp.dot(x_mv, w_mm_ref[...], preferred_element_type=jnp.float32)
    acc_mv = acc_mv + jnp.dot(x_s, w_sm_ref[...], preferred_element_type=jnp.float32)
    out_mv_ref[...] = (acc_mv + b_mv_ref[...]).astype(out_mv_ref.dtype)

    acc_s = jnp.dot(x_mv, w_ms_ref[...], preferred_element_type=jnp.float32)
    acc_s = acc_s + jnp.dot(x_s, w_ss_ref[...], preferred_element_type=jnp.float32)
    out_s_ref[...] = (acc_s + b_s_ref[...]).astype(out_s_ref.dtype)


def _vmem_budget_bytes() -> int:
    """Per-generation VMEM budget with ~16 MiB headroom (48 MiB on v7x, 112 MiB v5e/v6e)."""
    try:
        cap = int(pltpu.get_tpu_info().vmem_capacity_bytes)
    except Exception:
        cap = 64 * 1024 * 1024  # conservative fallback (v7x-sized)
    return max(cap - (16 << 20), 32 << 20)


def _choose_token_tile(T: int, stream_bytes_per_token: int,
                       resident_bytes: int, vmem_budget: int) -> int:
    if T <= 256:
        # One full-extent token block (exempt from the (8,128) rule); tiny problems
        # don't benefit from splitting across TensorCores.
        return T
    # VMEM left for the double-buffered streaming (x / out) tiles.
    avail = max(vmem_budget - resident_bytes - (2 << 20), 2 << 20)
    cap = max(int(avail // max(2 * stream_bytes_per_token, 1)), 128)
    # Lane/sublane-friendly tile (multiple of 128), big (pipeline/roofline), but
    # small enough that the grid has >= 2 steps so the "parallel" token axis can
    # shard across both TensorCores on v7x.
    tile = min(1024, cap, _round_up(-(-T // 2), 128))
    tile = max(128, (tile // 128) * 128)
    tile = min(tile, (T // 16) * 16)   # never exceed T for non-full-extent blocks
    return max(int(tile), 16)


@partial(jax.jit, static_argnames=("tile_tokens", "out_dtype"))
def equi_linear_forward(multivectors, scalars, fused, *, tile_tokens=None, out_dtype=None):
    """multivectors: (..., in_mv, 16); scalars: (..., in_s)."""
    w_mm, w_sm, w_ms, w_ss = fused["w_mm"], fused["w_sm"], fused["w_ms"], fused["w_ss"]
    b_mv, b_s = fused["b_mv"], fused["b_s"]

    batch_shape = multivectors.shape[:-2]
    in_mv = multivectors.shape[-2]
    in_s = scalars.shape[-1]
    out_mv16 = w_mm.shape[1]
    out_s = w_ss.shape[1]
    out_dt = multivectors.dtype if out_dtype is None else np.dtype(out_dtype)

    T = int(np.prod(batch_shape)) if batch_shape else 1
    # Token-major flattening only: free reshapes, no extra HBM pass.
    x_mv = multivectors.reshape(T, in_mv * MV)
    x_s = scalars.reshape(T, in_s)

    # ---- tile / VMEM sizing -------------------------------------------------
    stream_bytes = (in_mv * MV * x_mv.dtype.itemsize + in_s * x_s.dtype.itemsize
                    + (out_mv16 + out_s) * np.dtype(out_dt).itemsize)
    resident = 2 * sum(int(np.prod(a.shape)) * a.dtype.itemsize
                       for a in (w_mm, w_sm, w_ms, w_ss, b_mv, b_s))
    budget = _vmem_budget_bytes()
    if tile_tokens is not None:
        tile = int(tile_tokens)
        tile = T if tile >= T else max(16, (tile // 16) * 16)
    else:
        tile = _choose_token_tile(T, stream_bytes, resident, budget)
    grid_steps = -(-T // tile)
    vmem_needed = resident + 2 * tile * stream_bytes + (4 << 20)
    vmem_limit = int(min(budget, max(vmem_needed, 32 << 20)))

    stream = lambda t: (t, 0)   # streamed token tiles
    const = lambda t: (0, 0)    # resident weights / biases (fetched once)

    out_mv_flat, out_s_flat = pl.pallas_call(
        _equi_linear_kernel,
        out_shape=(jax.ShapeDtypeStruct((T, out_mv16), out_dt),
                   jax.ShapeDtypeStruct((T, out_s), out_dt)),
        grid_spec=pltpu.PrefetchScalarGridSpec(
            num_scalar_prefetch=0,
            grid=(grid_steps,),
            in_specs=[
                pl.BlockSpec((tile, in_mv * MV), stream),     # streamed mv tokens
                pl.BlockSpec((tile, in_s), stream),           # streamed scalar tokens
                pl.BlockSpec((in_mv * MV, out_mv16), const),  # resident W: mv -> mv
                pl.BlockSpec((in_s, out_mv16), const),        # resident W: s  -> mv
                pl.BlockSpec((in_mv * MV, out_s), const),     # resident W: mv -> s
                pl.BlockSpec((in_s, out_s), const),           # resident W: s  -> s
                pl.BlockSpec((1, out_mv16), const),           # resident bias (mv comp 0)
                pl.BlockSpec((1, out_s), const),              # resident bias (scalars)
            ],
            out_specs=(
                pl.BlockSpec((tile, out_mv16), stream),
                pl.BlockSpec((tile, out_s), stream),
            ),
        ),
        compiler_params=pltpu.CompilerParams(
            dimension_semantics=("parallel",),
            vmem_limit_bytes=vmem_limit,
        ),
    )(x_mv, x_s, w_mm, w_sm, w_ms, w_ss, b_mv, b_s)

    outputs_mv = out_mv_flat.reshape(*batch_shape, out_mv16 // MV, MV)
    outputs_s = out_s_flat.reshape(*batch_shape, out_s)
    return outputs_mv, outputs_s
    # TODO(synk): scalars=None / out_s_channels=None config variants (pure mv
    # bias path with embed_scalar, and the "no scalar output" path) are not
    # wired up; this covers the full in_s/out_s configuration of EquiLinear.


# ----------------------------------------------------------------------------
# Pure-JAX reference (mirrors the PyTorch forward) for verification.
# ----------------------------------------------------------------------------
def reference_forward(multivectors, scalars, params, basis):
    w = params["weight"]
    out_mv = jnp.einsum("jib,bxy,...ix->...jy", w, basis, multivectors)
    s2mv = scalars @ params["s2mvs_w"].T + params["s2mvs_b"]
    out_mv = out_mv.at[..., 0].add(s2mv)
    out_s = multivectors[..., 0] @ params["mvs2s_w"].T + params["mvs2s_b"]
    out_s = out_s + scalars @ params["s2s_w"].T
    return out_mv, out_s


if __name__ == "__main__":
    # Small shapes: batch=2, items=8 -> 16 tokens
    batch, items = 2, 8
    in_mv, out_mv = 4, 6
    in_s, out_s = 5, 7

    key = jax.random.PRNGKey(0)
    k_mv, k_s, k_p = jax.random.split(key, 3)
    multivectors = jax.random.normal(k_mv, (batch, items, in_mv, MV), jnp.float32)
    scalars = jax.random.normal(k_s, (batch, items, in_s), jnp.float32)

    basis = make_basis()
    params = init_params(k_p, in_mv, out_mv, in_s, out_s)

    # One-time weight precontraction (hoisted out of the per-call hot path).
    fused = precompute_fused_weights(params, basis)

    out_mv_k, out_s_k = equi_linear_forward(multivectors, scalars, fused)
    out_mv_k = jax.block_until_ready(out_mv_k)
    out_s_k = jax.block_until_ready(out_s_k)

    ref_mv, ref_s = reference_forward(multivectors, scalars, params, basis)
    assert out_mv_k.shape == (batch, items, out_mv, MV)
    assert out_s_k.shape == (batch, items, out_s)
    # bf16 weights + in-kernel bf16 token cast (f32 accumulation) -> loosened
    # tolerance vs the f32 reference.
    np.testing.assert_allclose(np.asarray(out_mv_k), np.asarray(ref_mv), atol=5e-2, rtol=5e-2)
    np.testing.assert_allclose(np.asarray(out_s_k), np.asarray(ref_s), atol=5e-2, rtol=5e-2)

    print("KERNEL_OK")
</pallas_src>

<mosaic_0001>
module attributes {stable_mosaic.version = 11 : i64} {
  func.func @_equi_linear_kernel(%arg0: i32, %arg1: memref<16x64xf32, #tpu.memory_space<vmem>>, %arg2: memref<16x5xf32, #tpu.memory_space<vmem>>, %arg3: memref<64x96xbf16, #tpu.memory_space<vmem>>, %arg4: memref<5x96xbf16, #tpu.memory_space<vmem>>, %arg5: memref<64x7xbf16, #tpu.memory_space<vmem>>, %arg6: memref<5x7xbf16, #tpu.memory_space<vmem>>, %arg7: memref<1x96xf32, #tpu.memory_space<vmem>>, %arg8: memref<1x7xf32, #tpu.memory_space<vmem>>, %arg9: memref<16x96xf32, #tpu.memory_space<vmem>>, %arg10: memref<16x7xf32, #tpu.memory_space<vmem>>) attributes {dimension_semantics = [#tpu.dimension_semantics<parallel>], iteration_bounds = array<i64: 1>, scalar_prefetch = 0 : i64, scratch_operands = 0 : i64, tpu.core_type = #tpu.core_type<tc>, window_params = [{transform_indices = @transform_0, window_bounds = array<i64: 16, 64>}, {transform_indices = @transform_1, window_bounds = array<i64: 16, 5>}, {pipeline_mode = #tpu.pipeline_mode<synchronous>, transform_indices = @transform_2, window_bounds = array<i64: 64, 96>}, {pipeline_mode = #tpu.pipeline_mode<synchronous>, transform_indices = @transform_3, window_bounds = array<i64: 5, 96>}, {pipeline_mode = #tpu.pipeline_mode<synchronous>, transform_indices = @transform_4, window_bounds = array<i64: 64, 7>}, {pipeline_mode = #tpu.pipeline_mode<synchronous>, transform_indices = @transform_5, window_bounds = array<i64: 5, 7>}, {pipeline_mode = #tpu.pipeline_mode<synchronous>, transform_indices = @transform_6, window_bounds = array<i64: 1, 96>}, {pipeline_mode = #tpu.pipeline_mode<synchronous>, transform_indices = @transform_7, window_bounds = array<i64: 1, 7>}, {transform_indices = @transform_8, window_bounds = array<i64: 16, 96>}, {transform_indices = @transform_9, window_bounds = array<i64: 16, 7>}]} {
    %c0 = arith.constant 0 : index
    %c0_0 = arith.constant 0 : index
    %0 = vector.load %arg1[%c0, %c0_0] : memref<16x64xf32, #tpu.memory_space<vmem>>, vector<16x64xf32>
    %1 = arith.truncf %0 : vector<16x64xf32> to vector<16x64xbf16>
    %c0_1 = arith.constant 0 : index
    %c0_2 = arith.constant 0 : index
    %2 = vector.load %arg2[%c0_1, %c0_2] : memref<16x5xf32, #tpu.memory_space<vmem>>, vector<16x5xf32>
    %3 = arith.truncf %2 : vector<16x5xf32> to vector<16x5xbf16>
    %c0_3 = arith.constant 0 : index
    %c0_4 = arith.constant 0 : index
    %4 = vector.load %arg3[%c0_3, %c0_4] : memref<64x96xbf16, #tpu.memory_space<vmem>>, vector<64x96xbf16>
    %cst = arith.constant dense<0.000000e+00> : vector<16x96xf32>
    %5 = tpu.matmul %1, %4, %cst {dimension_numbers = #tpu.dot_dimension_numbers<[1], [0], [0], [1], [0, 0, 1, 1], [], []>} : vector<16x64xbf16>, vector<64x96xbf16>, vector<16x96xf32> -> vector<16x96xf32>
    %c0_5 = arith.constant 0 : index
    %c0_6 = arith.constant 0 : index
    %6 = vector.load %arg4[%c0_5, %c0_6] : memref<5x96xbf16, #tpu.memory_space<vmem>>, vector<5x96xbf16>
    %cst_7 = arith.constant dense<0.000000e+00> : vector<16x96xf32>
    %7 = tpu.matmul %3, %6, %cst_7 {dimension_numbers = #tpu.dot_dimension_numbers<[1], [0], [0], [1], [0, 0, 1, 1], [], []>} : vector<16x5xbf16>, vector<5x96xbf16>, vector<16x96xf32> -> vector<16x96xf32>
    %8 = arith.addf %5, %7 : vector<16x96xf32>
    %c0_8 = arith.constant 0 : index
    %c0_9 = arith.constant 0 : index
    %9 = vector.load %arg7[%c0_8, %c0_9] : memref<1x96xf32, #tpu.memory_space<vmem>>, vector<1x96xf32>
    %10 = vector.broadcast %9 : vector<1x96xf32> to vector<16x96xf32>
    %11 = arith.addf %8, %10 : vector<16x96xf32>
    %c0_10 = arith.constant 0 : index
    %c0_11 = arith.constant 0 : index
    %12 = vector.load %arg9[%c0_10, %c0_11] : memref<16x96xf32, #tpu.memory_space<vmem>>, vector<16x96xf32>
    tpu.vector_store %arg9[%c0_10, %c0_11], %11 {strides = array<i32>} : memref<16x96xf32, #tpu.memory_space<vmem>>, vector<16x96xf32>,
    %c0_12 = arith.constant 0 : index
    %c0_13 = arith.constant 0 : index
    %13 = vector.load %arg5[%c0_12, %c0_13] : memref<64x7xbf16, #tpu.memory_space<vmem>>, vector<64x7xbf16>
    %cst_14 = arith.constant dense<0.000000e+00> : vector<16x7xf32>
    %14 = tpu.matmul %1, %13, %cst_14 {dimension_numbers = #tpu.dot_dimension_numbers<[1], [0], [0], [1], [0, 0, 1, 1], [], []>} : vector<16x64xbf16>, vector<64x7xbf16>, vector<16x7xf32> -> vector<16x7xf32>
    %c0_15 = arith.constant 0 : index
    %c0_16 = arith.constant 0 : index
    %15 = vector.load %arg6[%c0_15, %c0_16] : memref<5x7xbf16, #tpu.memory_space<vmem>>, vector<5x7xbf16>
    %cst_17 = arith.constant dense<0.000000e+00> : vector<16x7xf32>
    %16 = tpu.matmul %3, %15, %cst_17 {dimension_numbers = #tpu.dot_dimension_numbers<[1], [0], [0], [1], [0, 0, 1, 1], [], []>} : vector<16x5xbf16>, vector<5x7xbf16>, vector<16x7xf32> -> vector<16x7xf32>
    %17 = arith.addf %14, %16 : vector<16x7xf32>
    %c0_18 = arith.constant 0 : index
    %c0_19 = arith.constant 0 : index
    %18 = vector.load %arg8[%c0_18, %c0_19] : memref<1x7xf32, #tpu.memory_space<vmem>>, vector<1x7xf32>
    %19 = vector.broadcast %18 : vector<1x7xf32> to vector<16x7xf32>
    %20 = arith.addf %17, %19 : vector<16x7xf32>
    %c0_20 = arith.constant 0 : index
    %c0_21 = arith.constant 0 : index
    %21 = vector.load %arg10[%c0_20, %c0_21] : memref<16x7xf32, #tpu.memory_space<vmem>>, vector<16x7xf32>
    tpu.vector_store %arg10[%c0_20, %c0_21], %20 {strides = array<i32>} : memref<16x7xf32, #tpu.memory_space<vmem>>, vector<16x7xf32>,
    return
  }
  func.func @transform_0(%arg0: i32) -> (i32, i32) {
    %c0_i32 = arith.constant 0 : i32
    %c0_i32_0 = arith.constant 0 : i32
    return %arg0, %c0_i32 : i32, i32
  }
  func.func @transform_1(%arg0: i32) -> (i32, i32) {
    %c0_i32 = arith.constant 0 : i32
    %c0_i32_0 = arith.constant 0 : i32
    return %arg0, %c0_i32 : i32, i32
  }
  func.func @transform_2(%arg0: i32) -> (i32, i32) {
    %c0_i32 = arith.constant 0 : i32
    %c0_i32_0 = arith.constant 0 : i32
    %c0_i32_1 = arith.constant 0 : i32
    return %c0_i32, %c0_i32_0 : i32, i32
  }
  func.func @transform_3(%arg0: i32) -> (i32, i32) {
    %c0_i32 = arith.constant 0 : i32
    %c0_i32_0 = arith.constant 0 : i32
    %c0_i32_1 = arith.constant 0 : i32
    return %c0_i32, %c0_i32_0 : i32, i32
  }
  func.func @transform_4(%arg0: i32) -> (i32, i32) {
    %c0_i32 = arith.constant 0 : i32
    %c0_i32_0 = arith.constant 0 : i32
    %c0_i32_1 = arith.constant 0 : i32
    return %c0_i32, %c0_i32_0 : i32, i32
  }
  func.func @transform_5(%arg0: i32) -> (i32, i32) {
    %c0_i32 = arith.constant 0 : i32
    %c0_i32_0 = arith.constant 0 : i32
    %c0_i32_1 = arith.constant 0 : i32
    return %c0_i32, %c0_i32_0 : i32, i32
  }
  func.func @transform_6(%arg0: i32) -> (i32, i32) {
    %c0_i32 = arith.constant 0 : i32
    %c0_i32_0 = arith.constant 0 : i32
    %c0_i32_1 = arith.constant 0 : i32
    return %c0_i32, %c0_i32_0 : i32, i32
  }
  func.func @transform_7(%arg0: i32) -> (i32, i32) {
    %c0_i32 = arith.constant 0 : i32
    %c0_i32_0 = arith.constant 0 : i32
    %c0_i32_1 = arith.constant 0 : i32
    return %c0_i32, %c0_i32_0 : i32, i32
  }
  func.func @transform_8(%arg0: i32) -> (i32, i32) {
    %c0_i32 = arith.constant 0 : i32
    %c0_i32_0 = arith.constant 0 : i32
    return %arg0, %c0_i32 : i32, i32
  }
  func.func @transform_9(%arg0: i32) -> (i32, i32) {
    %c0_i32 = arith.constant 0 : i32
    %c0_i32_0 = arith.constant 0 : i32
    return %arg0, %c0_i32 : i32, i32
  }
}

</mosaic_0001>

<bundles_post_ra>
// kernel: equi_linear_forward.1
= control target key start
LH: loop header
LB: loop body
LE: loop exit
PB: predicated region body
PF: predicated region fallthrough
CT: control target
= control target key end

     0   :  { %vm51_vm0 = vcmask 1041408   ;;  %vm52_vm1 = vcmask 1042432   ;;  %v393_v0 = vmov 0.0   ;;  %v394_v2 = vmov 65535   ;;  %s510_s3 = inlined_call_operand.vmem [shape: bf16[5,96], index: 3, kind: input, shape index: {}]   ;;  %s511_s5 = inlined_call_operand.vmem [shape: bf16[5,7], index: 5, kind: input, shape index: {}]   ;;  %s512_s1 = inlined_call_operand.vmem [shape: f32[16,5], index: 1, kind: input, shape index: {}]   ;;  %s513_s2 = inlined_call_operand.vmem [shape: bf16[64,96], index: 2, kind: input, shape index: {}]   ;;  %s514_s4 = inlined_call_operand.vmem [shape: bf16[64,7], index: 4, kind: input, shape index: {}]   ;;  %s515_s0 = inlined_call_operand.vmem [shape: f32[16,64], index: 0, kind: input, shape index: {}]   ;;  %s516_s6 = inlined_call_operand.vmem [shape: f32[1,96], index: 6, kind: input, shape index: {}]   ;;  %s517_s7 = inlined_call_operand.vmem [shape: f32[1,7], index: 7, kind: input, shape index: {}]   ;;  %s518_s8 = inlined_call_operand.vmem [shape: f32[16,96], index: 8, kind: output, shape index: {0}]   ;;  %s519_s9 = inlined_call_operand.vmem [shape: f32[16,7], index: 9, kind: output, shape index: {1}]  }
   0x1   :  { %346 = vmatprep.subr.bf16.mxu1 %v393_v0  ;;  %364 = vmatprep.subr.bf16.mxu0 %v393_v0  ;;  %v46_v1 = vld [vmem:[%s510_s3] sm:$0x7]  ;;  %v53_v3 = vsel %vm51_vm0, 4294967295, %v394_v2  ;;  %vm395_vm2 = vmmov 0   ;;  %v36_v7 = vld [vmem:[%s512_s1 + $0x8] sm:$0xff]  ;;  %vm47_vm3 = vcmask 39936  }
   0x2   :  { %v188_v4 = vld [vmem:[%s511_s5] sm:$0x7]  ;;  %v54_v5 = vsel %vm52_vm1, %v53_v3, 0  ;;  %348 = vmatprep.mubr.msk.bf16.mxu1 %vm395_vm2, %v393_v0  ;;  %366 = vmatprep.mubr.msk.bf16.mxu0 %vm395_vm2, %v393_v0  ;;  %v387_v13 = vld [vmem:[%s513_s2 + $0x8] sm:$0xff]   ;;  %v389_v15 = vld [vmem:[%s513_s2 + $0x10] sm:$0xff]   ;;  %vm123_vm4 = vcmask 523264  }
   0x3   :  { %v35_v6 = vld [vmem:[%s512_s1] sm:$0xff]  ;;  %v56_v8 = vand.u32 %v54_v5, %v46_v1  ;;  %v190_v9 = vand.u32 %v188_v4, %v54_v5  ;;  %v388_v14 = vld [vmem:[%s514_s4 + $0x8] sm:$0xff]   ;;  %v390_v16 = vld [vmem:[%s514_s4 + $0x10] sm:$0xff]   ;;  %vm177_vm5 = vcmask 785408   ;;  %vm307_vm6 = vcmask 56320  }
   0x4   :  { %v37_v10 = vpack.c.bf16 %v36_v7, %v35_v6  ;;  %v385_v11 = vld [vmem:[%s513_s2] sm:$0xff]   ;;  %v391_v17 = vld [vmem:[%s513_s2 + $0x18] sm:$0xff]   ;;  %v33_v20 = vld [vmem:[%s515_s0 + $0x8] sm:$0xff] }
   0x5   :  { %347 = vmatpush3.bf16.msra.mxu1 %v56_v8  ;;  %365 = vmatpush3.bf16.msra.mxu0 %v190_v9  ;;  %v386_v12 = vld [vmem:[%s514_s4] sm:$0xff]   ;;  %v392_v18 = vld [vmem:[%s514_s4 + $0x18] sm:$0xff]  }
   0x6   :  { %352 = vmatprep.subr.bf16.mxu1 %v393_v0  ;;  %370 = vmatprep.subr.bf16.mxu0 %v393_v0  ;;  %v32_v19 = vld [vmem:[%s515_s0] sm:$0xff] }
   0x7   :  { %v34_v21 = vpack.c.bf16 %v33_v20, %v32_v19  ;;  %v324_v31 = vld [vmem:[%s516_s6] ss:$0 sm:$0xff] }
   0x8   :  { %349 = vmatmul.mubr.msk.bf16.vlgmr.msra.gmra.mrb[0].mxu1 %vm47_vm3, %v37_v10  ;;  %367 = vmatmul.mubr.msk.bf16.vlgmr.msra.gmra.mrb[0].mxu0 %vm47_vm3, %v37_v10  ;;  %v331_v33 = vld [vmem:[%s517_s7] ss:$0 sm:$0xff] }
   0x9   :  { %353 = vmatpush3.bf16.msra.mxu1 %v385_v11  ;;  %371 = vmatpush3.bf16.msra.mxu0 %v386_v12 }
   0xa   :  { %354 = vmatprep.subr.bf16.mxu1 %v393_v0  ;;  %372 = vmatprep.subr.bf16.mxu0 %v393_v0 }
   0xb   :  { %360 = vmatprep.mubr.msk.bf16.mxu1 %vm395_vm2, %v393_v0  ;;  %378 = vmatprep.mubr.msk.bf16.mxu0 %vm395_vm2, %v393_v0 }
   0xd   :  { %355 = vmatpush3.bf16.msra.mxu1 %v387_v13  ;;  %373 = vmatpush3.bf16.msra.mxu0 %v388_v14 }
   0xe   :  { %356 = vmatprep.subr.bf16.mxu1 %v393_v0  ;;  %374 = vmatprep.subr.bf16.mxu0 %v393_v0 }
  0x11   :  { %357 = vmatpush3.bf16.msra.mxu1 %v389_v15  ;;  %375 = vmatpush3.bf16.msra.mxu0 %v390_v16 }
  0x12   :  { %358 = vmatprep.subr.bf16.mxu1 %v393_v0  ;;  %376 = vmatprep.subr.bf16.mxu0 %v393_v0 }
  0x15   :  { %359 = vmatpush3.bf16.msra.mxu1 %v391_v17  ;;  %377 = vmatpush3.bf16.msra.mxu0 %v392_v18 }
  0x18   :  { %361 = vmatmul.mubr.msk.bf16.vlgmr.msra.gmra.mrb[4].mxu1 %vm123_vm4, %v34_v21  ;;  %379 = vmatmul.mubr.msk.bf16.vlgmr.msra.gmra.mrb[4].mxu0 %vm123_vm4, %v34_v21 }
  0xdb   :  { %v92_v22 = vpop.f32.mrb[0].mxu1  ;;  %v226_v23 = vpop.f32.mrb[0].mxu0 }
  0xdc   :  { %v350_v24 = vpop.f32.mrb[1].mxu1  ;;  %v368_v25 = vpop.f32.mrb[1].mxu0 }
  0xdd   :  { %v95_v26 = vpop.f32.mrb[2].mxu1  ;;  %v229_v27 = vpop.f32.mrb[2].mxu0 }
  0xde   :  { %v351_v28 = vpop.f32.mrb[3].mxu1  ;;  %v369_v29 = vpop.f32.mrb[3].mxu0 }
  0xeb   :  { %v161_v30 = vpop.f32.mrb[4].mxu1  ;;  %v291_v32 = vpop.f32.mrb[4].mxu0 }
  0xec   :  { %v162_v34 = vadd.f32 %v161_v30, %v92_v22  ;;  %v292_v35 = vadd.f32 %v291_v32, %v226_v23  ;;  %v362_v36 = vpop.f32.mrb[5].mxu1  ;;  %v380_v37 = vpop.f32.mrb[5].mxu0 }
  0xed   :  { %v164_v38 = vpop.f32.mrb[6].mxu1  ;;  %v294_v39 = vpop.f32.mrb[6].mxu0 }
  0xee   :  { %v175_v40 = vadd.f32 %v324_v31, %v162_v34  ;;  %v305_v41 = vadd.f32 %v331_v33, %v292_v35  ;;  %v165_v42 = vadd.f32 %v164_v38, %v95_v26  ;;  %v295_v43 = vadd.f32 %v294_v39, %v229_v27  ;;  %v363_v44 = vpop.f32.mrb[7].mxu1  ;;  %v381_v45 = vpop.f32.mrb[7].mxu0 }
  0xf0   :  { %178 = vst.msk [vmem:[%s518_s8] sm:$0xff] %vm177_vm5, %v175_v40  ;;  %v176_v46 = vadd.f32 %v324_v31, %v165_v42  ;;  %v306_v47 = vadd.f32 %v331_v33, %v295_v43 }
  0xf1   :  { %308 = vst.msk [vmem:[%s519_s9] sm:$0xff] %vm307_vm6, %v305_v41 }
  0xf2   :  { %179 = vst.msk [vmem:[%s518_s8 + $0x8] sm:$0xff] %vm177_vm5, %v176_v46 }
  0xf3   :  { %309 = vst.msk [vmem:[%s519_s9 + $0x8] sm:$0xff] %vm307_vm6, %v306_v47 }

</bundles_post_ra>
